<compile_context>
chip_gen: v7x
topology: tpu7x:2x2x1
jax: 0.10.0
libtpu: 0.0.40
codegen_flags: <defaults>
</compile_context>

<pallas_src>
import jax
import jax.numpy as jnp
from jax import lax
from jax.experimental import pallas as pl
from jax.experimental.pallas import tpu as pltpu

_EPS = 1e-8


def _norm_kernel_real(x_ref, o_ref):
    x = x_ref[...]                                        # (rt, S) f32
    a = jnp.abs(x)
    mn = jnp.min(a, axis=-1, keepdims=True)               # (rt, 1)
    mx = jnp.max(a, axis=-1, keepdims=True)               # (rt, 1)
    inv = 1.0 / (mx - mn + _EPS)                          # tiny per-row tensor
    o_ref[...] = (x - mn) * inv


def _norm_kernel_complex(re_ref, im_ref, ore_ref, oim_ref):
    re = re_ref[...]                                      # (rt, S) f32
    im = im_ref[...]                                      # (rt, S) f32
    m2 = re * re + im * im                                # |x|^2, lane-dense
    mn = jnp.sqrt(jnp.min(m2, axis=-1, keepdims=True))    # min |x| (sqrt monotone)
    mx = jnp.sqrt(jnp.max(m2, axis=-1, keepdims=True))    # max |x|
    inv = 1.0 / (mx - mn + _EPS)
    ore_ref[...] = (re - mn) * inv
    oim_ref[...] = im * inv


def _pick_row_tile(n_rows, n_cols, target_bytes=1 << 20):
    """Largest row tile (multiple of 8) with tile <= ~1 MiB per buffer."""
    rows = max(1, target_bytes // (n_cols * 4))
    if rows >= n_rows or n_rows <= 8:
        return n_rows                                     # full dim: always legal
    return max(8, (rows // 8) * 8)


def _compiler_params():
    return pltpu.CompilerParams(
        dimension_semantics=("parallel",),
        vmem_limit_bytes=48 * 1024 * 1024,                # < 64 MiB physical on v7x
    )


def _normalize_rows_real(x2d):
    R, S = x2d.shape
    rt = _pick_row_tile(R, S)
    return pl.pallas_call(
        _norm_kernel_real,
        out_shape=jax.ShapeDtypeStruct((R, S), jnp.float32),
        grid_spec=pltpu.PrefetchScalarGridSpec(
            num_scalar_prefetch=0,
            grid=(pl.cdiv(R, rt),),
            in_specs=[pl.BlockSpec((rt, S), lambda i: (i, 0))],
            out_specs=pl.BlockSpec((rt, S), lambda i: (i, 0)),
        ),
        compiler_params=_compiler_params(),
    )(x2d)


def _normalize_rows_complex(re2d, im2d):
    R, S = re2d.shape
    rt = _pick_row_tile(R, S)
    spec = pl.BlockSpec((rt, S), lambda i: (i, 0))
    return pl.pallas_call(
        _norm_kernel_complex,
        out_shape=(jax.ShapeDtypeStruct((R, S), jnp.float32),
                   jax.ShapeDtypeStruct((R, S), jnp.float32)),
        grid_spec=pltpu.PrefetchScalarGridSpec(
            num_scalar_prefetch=0,
            grid=(pl.cdiv(R, rt),),
            in_specs=[spec, spec],
            out_specs=(spec, spec),
        ),
        compiler_params=_compiler_params(),
    )(re2d, im2d)


def normalize_batch(x):
    """JAX/Pallas equivalent of NormalizeBatch1.forward (returns a new array)."""
    x = jnp.asarray(x)
    assert x.ndim == 5
    B, N, C, H, W = x.shape
    R, S = B * N * C, H * W
    # TODO(synk): for extremely large spatial planes (8 * H * W * 4B per buffer
    # exceeding VMEM) a spatially-tiled two-pass reduction would be needed;
    # typical planes fit comfortably in a single block per row tile.
    if jnp.issubdtype(x.dtype, jnp.complexfloating):
        xc = x.astype(jnp.complex64)
        re = jnp.real(xc).reshape(R, S).astype(jnp.float32)
        im = jnp.imag(xc).reshape(R, S).astype(jnp.float32)
        ore, oim = _normalize_rows_complex(re, im)
        return lax.complex(ore, oim).reshape(B, N, C, H, W)
    xf = x.astype(jnp.float32).reshape(R, S)
    return _normalize_rows_real(xf).reshape(B, N, C, H, W)


def _reference(x):
    """Plain-JAX reference matching the PyTorch module."""
    B, N, C, H, W = x.shape
    a = jnp.abs(x).reshape(B, N, C, H * W)
    mn = a.min(axis=-1).reshape(B, N, C, 1, 1)
    mx = a.max(axis=-1).reshape(B, N, C, 1, 1)
    return (x - mn) / (mx - mn + _EPS)


if __name__ == "__main__":
    key = jax.random.PRNGKey(0)
    k1, k2, k3 = jax.random.split(key, 3)
    shape = (2, 2, 4, 16, 16)                             # (B, N, C, H, W)

    # Real-valued input (literal module semantics).
    x_real = jax.random.normal(k1, shape, dtype=jnp.float32)
    y = jax.block_until_ready(normalize_batch(x_real))
    y_ref = _reference(x_real)
    assert y.shape == shape and y.dtype == jnp.float32
    assert jnp.allclose(y, y_ref, rtol=2e-5, atol=1e-6)

    # Complex-valued input (torch.abs == magnitude).
    x_cplx = lax.complex(jax.random.normal(k2, shape, dtype=jnp.float32),
                         jax.random.normal(k3, shape, dtype=jnp.float32))
    yc = jax.block_until_ready(normalize_batch(x_cplx))
    yc_ref = _reference(x_cplx)
    assert yc.shape == shape and yc.dtype == jnp.complex64
    assert jnp.allclose(yc, yc_ref, rtol=1e-4, atol=1e-5)

    print("KERNEL_OK")
</pallas_src>

<mosaic_0001>
module attributes {stable_mosaic.version = 11 : i64} {
  func.func @_norm_kernel_real(%arg0: i32, %arg1: memref<16x256xf32, #tpu.memory_space<vmem>>, %arg2: memref<16x256xf32, #tpu.memory_space<vmem>>) attributes {dimension_semantics = [#tpu.dimension_semantics<parallel>], iteration_bounds = array<i64: 1>, scalar_prefetch = 0 : i64, scratch_operands = 0 : i64, tpu.core_type = #tpu.core_type<tc>, window_params = [{transform_indices = @transform_0, window_bounds = array<i64: 16, 256>}, {transform_indices = @transform_1, window_bounds = array<i64: 16, 256>}]} {
    %c0 = arith.constant 0 : index
    %c0_0 = arith.constant 0 : index
    %0 = vector.load %arg1[%c0, %c0_0] : memref<16x256xf32, #tpu.memory_space<vmem>>, vector<16x256xf32>
    %1 = math.absf %0 : vector<16x256xf32>
    %cst = arith.constant dense<0x7F800000> : vector<16xf32>
    %2 = vector.multi_reduction <minimumf>, %1, %cst [1] : vector<16x256xf32> to vector<16xf32>
    %3 = vector.shape_cast %2 : vector<16xf32> to vector<16x1xf32>
    %cst_1 = arith.constant dense<0xFF800000> : vector<16xf32>
    %4 = vector.multi_reduction <maximumf>, %1, %cst_1 [1] : vector<16x256xf32> to vector<16xf32>
    %5 = vector.shape_cast %4 : vector<16xf32> to vector<16x1xf32>
    %6 = arith.subf %5, %3 : vector<16x1xf32>
    %cst_2 = arith.constant 9.99999993E-9 : f32
    %7 = vector.broadcast %cst_2 : f32 to vector<16x1xf32>
    %8 = arith.addf %6, %7 : vector<16x1xf32>
    %cst_3 = arith.constant 1.000000e+00 : f32
    %9 = vector.broadcast %cst_3 : f32 to vector<16x1xf32>
    %10 = arith.divf %9, %8 : vector<16x1xf32>
    %11 = vector.broadcast %3 : vector<16x1xf32> to vector<16x256xf32>
    %12 = arith.subf %0, %11 : vector<16x256xf32>
    %13 = vector.broadcast %10 : vector<16x1xf32> to vector<16x256xf32>
    %14 = arith.mulf %12, %13 : vector<16x256xf32>
    %c0_4 = arith.constant 0 : index
    %c0_5 = arith.constant 0 : index
    %15 = vector.load %arg2[%c0_4, %c0_5] : memref<16x256xf32, #tpu.memory_space<vmem>>, vector<16x256xf32>
    tpu.vector_store %arg2[%c0_4, %c0_5], %14 {strides = array<i32>} : memref<16x256xf32, #tpu.memory_space<vmem>>, vector<16x256xf32>,
    return
  }
  func.func @transform_0(%arg0: i32) -> (i32, i32) {
    %c0_i32 = arith.constant 0 : i32
    %c0_i32_0 = arith.constant 0 : i32
    return %arg0, %c0_i32 : i32, i32
  }
  func.func @transform_1(%arg0: i32) -> (i32, i32) {
    %c0_i32 = arith.constant 0 : i32
    %c0_i32_0 = arith.constant 0 : i32
    return %arg0, %c0_i32 : i32, i32
  }
}

</mosaic_0001>

<bundles_post_ra>
// kernel: tpu_custom_call.1
= control target key start
LH: loop header
LB: loop body
LE: loop exit
PB: predicated region body
PF: predicated region fallthrough
CT: control target
= control target key end

     0   :  { %6 = vsyncpa [#allocation3], 0  ;;  %s180_s0 = inlined_call_operand.hbm [shape: f32[16,256], index: 0, kind: input, shape index: {}]   ;;  %s181_s1 = inlined_call_operand.hbm [shape: f32[16,256], index: 1, kind: output, shape index: {}]  }
   0x1   :  { %7 = vsyncpa [#allocation4], 0  ;;  %s136_s6 = smov [#allocation2]   ;;  %s88_s10 = scalar_lea.hbm %s180_s0, 512 }
   0x2   :  { %s13_s7 = sshll.u32 %s136_s6, 4  ;;  %p89_p0 = scmp.ne.s32.totalorder %s180_s0, %s88_s10  ;;  %s14_s7 = int_to_ptr.vmem [resolvable:$true] %s13_s7 }
   0x3   :  { %p92_p1 = scmp.lt.u32.totalorder %s88_s10, %s180_s0 }
   0x5   :  { %p94_p2 = pnand %p92_p1, %p89_p0 }
   0x7   :  { %97 = shalt.err (!%p94_p2)
}
   0x8   :  { %s98_s15 = scalar_lea.vmem %s14_s7, 512  ;;  %p103_p4 = scmp.lt.s32.totalorder %s14_s7, %s14_s7 }
   0x9   :  { %p99_p3 = scmp.ne.s32.totalorder %s14_s7, %s98_s15  ;;  %p104_p5 = scmp.lt.s32.totalorder %s98_s15, %s98_s15 }
   0xb   :  { %p105_p6 = por %p104_p5, %p103_p4 }
   0xd   :  { %p106_p7 = pnand %p105_p6, %p99_p3 }
   0xf   :  { %109 = shalt.err (!%p106_p7)
}
  0x10   :  { %s137_s16 = smov 256   ;;  %s138_s17 = smov 16  }
  0x11   :  { %19 = dma.hbm_to_vmem [thread:$0]  %s180_s0, 512, %s14_s7, [#allocation3], %s137_s16, %s137_s16, %s138_s17  }
  0x12   :  { %132 = dma.done.wait [#allocation3], 512  }
  0x13   :  { %133 = vsyncadd [#allocation3], 4294966784  ;;  %v23_v0 = vld [vmem:[#allocation2] sm:$0xff]  ;;  %v24_v1 = vld [vmem:[#allocation2 + $0x8] sm:$0xff]  ;;  %s139_s0 = smov [#allocation5]  }
  0x14   :  { %v25_v2 = vld [vmem:[#allocation2 + $0x10] sm:$0xff]  ;;  %v27_v3 = vand.u32 2147483647, %v23_v0  ;;  %v28_v4 = vand.u32 2147483647, %v24_v1  ;;  %v26_v5 = vld [vmem:[#allocation2 + $0x18] sm:$0xff] }
  0x15   :  { %v29_v6 = vand.u32 2147483647, %v25_v2  ;;  %v30_v7 = vand.u32 2147483647, %v26_v5  ;;  %s68_s20 = sshll.u32 %s139_s0, 4  ;;  %s69_s20 = int_to_ptr.vmem [resolvable:$true] %s68_s20 }
  0x16   :  { %v37_v8 = vmax.f32 %v27_v3, %v28_v4  ;;  %v31_v9 = vmin.f32 %v27_v3, %v28_v4  ;;  %s110_s21 = scalar_lea.vmem %s69_s20, 512  ;;  %p115_p9 = scmp.lt.s32.totalorder %s69_s20, %s69_s20 }
  0x17   :  { %v40_v10 = vmax.f32 %v29_v6, %v30_v7  ;;  %v34_v11 = vmin.f32 %v29_v6, %v30_v7  ;;  %p111_p8 = scmp.ne.s32.totalorder %s69_s20, %s110_s21  ;;  %p116_p10 = scmp.lt.s32.totalorder %s110_s21, %s110_s21 }
  0x18   :  { %38 = vmax.xlane.f32.xlu1 %v37_v8  ;;  %32 = vmin.xlane.f32.xlu0 %v31_v9 }
  0x19   :  { %p117_p11 = por %p116_p10, %p115_p9 }
  0x1b   :  { %p118_p12 = pnand %p117_p11, %p111_p8 }
  0x1c   :  { %41 = vmax.xlane.f32.xlu1 %v40_v10  ;;  %35 = vmin.xlane.f32.xlu0 %v34_v11 }
  0xa5   :  { %v39_v12 = vpop.xlane.xlu1 %38  ;;  %v33_v13 = vpop.xlane.xlu0 %32 }
  0xa6   :  { %v43_v14 = vsub.f32 %v39_v12, %v33_v13  ;;  %v51_v20 = vsub.f32 %v23_v0, %v33_v13  ;;  %v52_v21 = vsub.f32 %v24_v1, %v33_v13 }
  0xa8   :  { %v45_v15 = vadd.f32 1e-08, %v43_v14 }
  0xa9   :  { %v42_v16 = vpop.xlane.xlu1 %41  ;;  %v36_v17 = vpop.xlane.xlu0 %35 }
  0xaa   :  { %84 = vrcp.f32 %v45_v15  ;;  %v44_v18 = vsub.f32 %v42_v16, %v36_v17  ;;  %v53_v25 = vsub.f32 %v25_v2, %v36_v17  ;;  %v54_v26 = vsub.f32 %v26_v5, %v36_v17 }
  0xac   :  { %v46_v19 = vadd.f32 1e-08, %v44_v18 }
  0xae   :  { %86 = vrcp.f32 %v46_v19 }
  0xb4   :  { %v85_v22 = vpop.eup %84 }
  0xb5   :  { %v55_v23 = vmul.f32 %v85_v22, %v51_v20  ;;  %v56_v24 = vmul.f32 %v85_v22, %v52_v21 }
  0xb7   :  { %59 = vst [vmem:[#allocation5] sm:$0xff] %v55_v23  ;;  %60 = vst [vmem:[#allocation5 + $0x8] sm:$0xff] %v56_v24 }
  0xb8   :  { %v87_v27 = vpop.eup %86 }
  0xb9   :  { %v57_v28 = vmul.f32 %v87_v27, %v53_v25  ;;  %v58_v29 = vmul.f32 %v87_v27, %v54_v26 }
  0xbb   :  { %61 = vst [vmem:[#allocation5 + $0x10] sm:$0xff] %v57_v28  ;;  %62 = vst [vmem:[#allocation5 + $0x18] sm:$0xff] %v58_v29 }
  0xbc   :  { %121 = shalt.err (!%p118_p12)
}
  0xbd   :  { %s122_s24 = scalar_lea.hbm %s181_s1, 512 }
  0xbe   :  { %p123_p13 = scmp.ne.s32.totalorder %s181_s1, %s122_s24  ;;  %p126_p0 = scmp.lt.u32.totalorder %s122_s24, %s181_s1 }
  0xc0   :  { %p128_p1 = pnand %p126_p0, %p123_p13 }
  0xc2   :  { %131 = shalt.err (!%p128_p1)
}
  0xc3   :  { %74 = dma.vmem_to_hbm [thread:$0]  %s69_s20, 512, %s181_s1, [#allocation4], %s137_s16, %s137_s16, %s138_s17  }
  0xc4   :  { %134 = dma.done.wait [#allocation4], 512  }
  0xc5   :  { %135 = vsyncadd [#allocation4], 4294966784 }
  0xc6   :  { %78 = vsyncpa [#allocation3], 1 }
  0xc7   :  { %79 = vsyncpa [#allocation4], 1 }

</bundles_post_ra>
